<compile_context>
chip_gen: v5e
topology: v5e:2x2
jax: 0.10.0
libtpu: 0.0.40
codegen_flags: <defaults>
</compile_context>

<pallas_src>
import functools

import jax
import jax.numpy as jnp
from jax.experimental import pallas as pl
from jax.experimental.pallas import tpu as pltpu


_WS_BUDGET_BYTES = 32 << 20    # per-tile VMEM working-set target
_VMEM_LIMIT_BYTES = 48 << 20   # scoped VMEM limit (<= 64 MiB physical on v7x)
_AUX_ROW_BYTES = 5 * 128 * 4   # lane-padded (rows,1) buffers: scratch + 2x tgt + 2x out


def _round_up(x, m):
    return -(-x // m) * m


def _ce_loss_kernel(logits_ref, tgt_ref, loss_ref, *scratch,
                    confidence, eps_over_c, nk):
    """Process one (block_b, block_c) logits tile.

    logits_ref: (TB, TC) native dtype; tgt_ref: (TB, 1) f32 target logit;
    loss_ref: (TB, 1) f32. scratch (only when nk > 1): a single (TB, 128) f32
    buffer whose lane columns 0..2 hold the online-softmax state (m, l, sum_x).
    """
    x = logits_ref[...].astype(jnp.float32)            # (TB, TC) f32

    if nk == 1:
        # Common fast path: full class extent in one tile -> single pass,
        # no scratch state, no accumulator stores.
        m = jnp.max(x, axis=-1, keepdims=True)
        lse = m + jnp.log(jnp.sum(jnp.exp(x - m), axis=-1, keepdims=True))
        sx = jnp.sum(x, axis=-1, keepdims=True)
        # loss = conf*(lse - x_t) + eps*(lse - sum(x)/C) = lse - conf*x_t - (eps/C)*sum(x)
        loss_ref[...] = lse - confidence * tgt_ref[...] - eps_over_c * sx
        return

    # Huge-vocabulary path: online logsumexp across class tiles.
    acc_ref, = scratch
    k = pl.program_id(1)

    tile_max = jnp.max(x, axis=-1, keepdims=True)       # (TB, 1)
    tile_sum = jnp.sum(x, axis=-1, keepdims=True)       # (TB, 1)

    @pl.when(k == 0)
    def _():
        acc_ref[:, 0:1] = jnp.full_like(tile_max, -jnp.inf)  # running max m
        acc_ref[:, 1:2] = jnp.zeros_like(tile_max)           # running sum-exp l
        acc_ref[:, 2:3] = jnp.zeros_like(tile_max)           # running sum of x

    m_old = acc_ref[:, 0:1]
    m_new = jnp.maximum(m_old, tile_max)
    acc_ref[:, 1:2] = (acc_ref[:, 1:2] * jnp.exp(m_old - m_new)
                       + jnp.sum(jnp.exp(x - m_new), axis=-1, keepdims=True))
    acc_ref[:, 0:1] = m_new
    acc_ref[:, 2:3] = acc_ref[:, 2:3] + tile_sum

    @pl.when(k == nk - 1)
    def _():
        lse = acc_ref[:, 0:1] + jnp.log(acc_ref[:, 1:2])
        loss_ref[...] = (lse - confidence * tgt_ref[...]
                         - eps_over_c * acc_ref[:, 2:3])


def _choose_tiles(B, C, itemsize):
    """Pick (block_b, block_c).

    Budget per batch tile = 2x native logits block (double buffer) + 1x f32
    cast temp + lane-padded per-row aux buffers, targeting ~32 MiB so DMA time
    dominates the ~0.35us per-grid-step overhead while leaving headroom under
    v7x's 64 MiB physical VMEM.
    """
    sub = max(8, 32 // itemsize)   # sublane granularity: 8 f32 / 16 bf16 / 32 i8
    row_cost = lambda c: c * (2 * itemsize + 4) + _AUX_ROW_BYTES

    # Class tiling only when even a minimum-height (sub-row) full-C slab blows
    # the budget (very large vocabularies).
    block_c = C
    if C % 128 == 0 and sub * row_cost(C) > _WS_BUDGET_BYTES:
        best = 128
        d = 256
        while d < C:
            if C % d == 0 and sub * row_cost(d) <= _WS_BUDGET_BYTES:
                best = d
            d += 128
        block_c = best
    # TODO(synk): a very large C that is not a multiple of 128 cannot be
    # class-tiled here and may exceed the scoped VMEM limit.

    budget_rows = max(sub, (_WS_BUDGET_BYTES // row_cost(block_c)) // sub * sub)
    b_pad_min = _round_up(B, sub)

    if b_pad_min <= budget_rows:
        # Whole (padded) batch fits one tile. Split into >=2 batch tiles so the
        # "parallel" axis shards across v7x's two TensorCores and DMA can
        # overlap compute on v5e/v6e.
        if b_pad_min < 2 * sub:
            return b_pad_min, block_c
        half = _round_up(b_pad_min // 2, sub)
        block_b = half                       # may require a little row padding
        d = (b_pad_min // 2) // sub * sub
        while d >= max(sub, half // 2):
            if b_pad_min % d == 0:           # divisor: no extra batch padding
                block_b = d
                break
            d -= sub
        return block_b, block_c

    # Many tiles: use the budget, preferring a size that divides the
    # sub-rounded batch (avoids padding/copying the whole logits array).
    block_b = budget_rows
    d = budget_rows
    while d >= max(sub, budget_rows // 2):
        if b_pad_min % d == 0:
            block_b = d
            break
        d -= sub
    return block_b, block_c


def ce_loss(logits, target, *, eps=0.1, block_b=None, block_c=None):
    """Label-smoothed cross entropy, per-example (no reduction).

    logits: [B, C] (any float dtype), target: [B] int -> loss: [B] float32.
    NOTE: targets are assumed to be valid class indices in [0, C); there is no
    ignore_index handling (matches the reference PyTorch module).
    """
    B, C = logits.shape
    confidence = 1.0 - eps
    itemsize = jnp.dtype(logits.dtype).itemsize
    sub = max(8, 32 // itemsize)

    auto_b, auto_c = _choose_tiles(B, C, itemsize)
    if block_b is None:
        block_b = auto_b
    if block_c is None:
        block_c = auto_c

    assert block_b % sub == 0, (
        f"block_b={block_b} must be a multiple of the sublane granularity {sub}")
    assert block_c == C or (C % block_c == 0 and block_c % 128 == 0), (
        f"block_c={block_c} must equal C or be a multiple of 128 dividing C={C}")

    nk = C // block_c
    b_pad = _round_up(B, block_b)

    # Target-logit gather hoisted out of the kernel's hot loop: B scattered
    # element reads in the wrapper, negligible HBM traffic.
    tgt_logit = jnp.take_along_axis(
        logits, target.reshape(B, 1).astype(jnp.int32), axis=-1
    ).astype(jnp.float32)

    x = logits
    if b_pad != B:
        # Pad rows with zeros (finite -> no NaN); padded rows are sliced off.
        x = jnp.pad(x, ((0, b_pad - B), (0, 0)))
        tgt_logit = jnp.pad(tgt_logit, ((0, b_pad - B), (0, 0)))

    kernel = functools.partial(
        _ce_loss_kernel,
        confidence=float(confidence),
        eps_over_c=float(eps) / C,
        nk=nk,
    )

    grid = (b_pad // block_b, nk)
    scratch_shapes = [] if nk == 1 else [pltpu.VMEM((block_b, 128), jnp.float32)]

    out = pl.pallas_call(
        kernel,
        out_shape=jax.ShapeDtypeStruct((b_pad, 1), jnp.float32),
        grid_spec=pltpu.PrefetchScalarGridSpec(
            num_scalar_prefetch=0,
            grid=grid,
            in_specs=[
                pl.BlockSpec((block_b, block_c), lambda i, k: (i, k)),
                pl.BlockSpec((block_b, 1), lambda i, k: (i, 0)),
            ],
            out_specs=pl.BlockSpec((block_b, 1), lambda i, k: (i, 0)),
            scratch_shapes=scratch_shapes,
        ),
        compiler_params=pltpu.CompilerParams(
            dimension_semantics=("parallel", "arbitrary"),
            vmem_limit_bytes=_VMEM_LIMIT_BYTES,
        ),
        cost_estimate=pl.CostEstimate(
            flops=5 * b_pad * C,
            transcendentals=b_pad * C,
            bytes_accessed=b_pad * C * itemsize + 3 * b_pad * 4,
        ),
    )(x, tgt_logit)

    return out[:B, 0]


def _ref_ce_loss(logits, target, eps=0.1):
    # Pure-JAX reference matching the PyTorch module.
    logprobs = jax.nn.log_softmax(logits.astype(jnp.float32), axis=-1)
    nll = -jnp.take_along_axis(logprobs, target[:, None], axis=-1)[:, 0]
    smooth = -jnp.mean(logprobs, axis=-1)
    return (1.0 - eps) * nll + eps * smooth


if __name__ == "__main__":
    key = jax.random.PRNGKey(0)
    k1, k2, k3, k4, k5, k6 = jax.random.split(key, 6)

    # Test 1: small f32 case, single tile.
    B, C = 8, 32
    logits = jax.random.normal(k1, (B, C), dtype=jnp.float32)
    target = jax.random.randint(k2, (B,), 0, C, dtype=jnp.int32)
    loss = jax.block_until_ready(ce_loss(logits, target, eps=0.1))
    ref = _ref_ce_loss(logits, target, eps=0.1)
    assert loss.shape == (B,)
    assert jnp.allclose(loss, ref, atol=1e-5, rtol=1e-5), (loss, ref)

    # Test 2: force batch + class tiling (exercises online-softmax accumulators).
    B2, C2 = 32, 256
    logits2 = jax.random.normal(k3, (B2, C2), dtype=jnp.float32) * 3.0
    target2 = jax.random.randint(k4, (B2,), 0, C2, dtype=jnp.int32)
    loss2 = jax.block_until_ready(
        ce_loss(logits2, target2, eps=0.1, block_b=8, block_c=128))
    ref2 = _ref_ce_loss(logits2, target2, eps=0.1)
    assert jnp.allclose(loss2, ref2, atol=1e-5, rtol=1e-5), (loss2, ref2)

    # Test 3: bf16 logits fed natively (no wrapper upcast), cast in-kernel.
    logits3 = logits2[:16, :128].astype(jnp.bfloat16)
    target3 = target2[:16] % 128
    loss3 = jax.block_until_ready(ce_loss(logits3, target3, eps=0.1))
    ref3 = _ref_ce_loss(logits3.astype(jnp.float32), target3, eps=0.1)
    assert jnp.allclose(loss3, ref3, atol=1e-3, rtol=1e-3), (loss3, ref3)

    # Test 4: awkward batch (B=20 -> padded) with auto tiling (>=2 batch tiles).
    B4, C4 = 20, 96
    logits4 = jax.random.normal(k5, (B4, C4), dtype=jnp.float32)
    target4 = jax.random.randint(k6, (B4,), 0, C4, dtype=jnp.int32)
    loss4 = jax.block_until_ready(ce_loss(logits4, target4, eps=0.1))
    ref4 = _ref_ce_loss(logits4, target4, eps=0.1)
    assert loss4.shape == (B4,)
    assert jnp.allclose(loss4, ref4, atol=1e-5, rtol=1e-5), (loss4, ref4)

    print("KERNEL_OK")
</pallas_src>

<mosaic_0001>
module attributes {stable_mosaic.version = 11 : i64} {
  func.func @_ce_loss_kernel(%arg0: i32, %arg1: i32, %arg2: memref<8x32xf32, #tpu.memory_space<vmem>>, %arg3: memref<8x1xf32, #tpu.memory_space<vmem>>, %arg4: memref<8x1xf32, #tpu.memory_space<vmem>>) attributes {dimension_semantics = [#tpu.dimension_semantics<parallel>, #tpu.dimension_semantics<arbitrary>], iteration_bounds = array<i64: 1, 1>, scalar_prefetch = 0 : i64, scratch_operands = 0 : i64, tpu.core_type = #tpu.core_type<tc>, window_params = [{transform_indices = @transform_0, window_bounds = array<i64: 8, 32>}, {transform_indices = @transform_1, window_bounds = array<i64: 8, 1>}, {transform_indices = @transform_2, window_bounds = array<i64: 8, 1>}]} {
    %c0 = arith.constant 0 : index
    %c0_0 = arith.constant 0 : index
    %0 = vector.load %arg2[%c0, %c0_0] : memref<8x32xf32, #tpu.memory_space<vmem>>, vector<8x32xf32>
    %cst = arith.constant dense<0xFF800000> : vector<8xf32>
    %1 = vector.multi_reduction <maximumf>, %0, %cst [1] : vector<8x32xf32> to vector<8xf32>
    %2 = vector.shape_cast %1 : vector<8xf32> to vector<8x1xf32>
    %3 = vector.broadcast %2 : vector<8x1xf32> to vector<8x32xf32>
    %4 = arith.subf %0, %3 : vector<8x32xf32>
    %5 = math.exp %4 : vector<8x32xf32>
    %cst_1 = arith.constant dense<0.000000e+00> : vector<8xf32>
    %6 = vector.multi_reduction <add>, %5, %cst_1 [1] : vector<8x32xf32> to vector<8xf32>
    %7 = vector.shape_cast %6 : vector<8xf32> to vector<8x1xf32>
    %8 = math.log %7 : vector<8x1xf32>
    %9 = arith.addf %2, %8 : vector<8x1xf32>
    %cst_2 = arith.constant dense<0.000000e+00> : vector<8xf32>
    %10 = vector.multi_reduction <add>, %0, %cst_2 [1] : vector<8x32xf32> to vector<8xf32>
    %11 = vector.shape_cast %10 : vector<8xf32> to vector<8x1xf32>
    %c0_3 = arith.constant 0 : index
    %c0_4 = arith.constant 0 : index
    %12 = vector.load %arg3[%c0_3, %c0_4] : memref<8x1xf32, #tpu.memory_space<vmem>>, vector<8x1xf32>
    %cst_5 = arith.constant 0.899999976 : f32
    %13 = vector.broadcast %cst_5 : f32 to vector<8x1xf32>
    %14 = arith.mulf %13, %12 : vector<8x1xf32>
    %15 = arith.subf %9, %14 : vector<8x1xf32>
    %cst_6 = arith.constant 3.125000e-03 : f32
    %16 = vector.broadcast %cst_6 : f32 to vector<8x1xf32>
    %17 = arith.mulf %16, %11 : vector<8x1xf32>
    %18 = arith.subf %15, %17 : vector<8x1xf32>
    %c0_7 = arith.constant 0 : index
    %c0_8 = arith.constant 0 : index
    %19 = vector.load %arg4[%c0_7, %c0_8] : memref<8x1xf32, #tpu.memory_space<vmem>>, vector<8x1xf32>
    tpu.vector_store %arg4[%c0_7, %c0_8], %18 {strides = array<i32>} : memref<8x1xf32, #tpu.memory_space<vmem>>, vector<8x1xf32>,
    return
  }
  func.func @transform_0(%arg0: i32, %arg1: i32) -> (i32, i32) {
    %c0_i32 = arith.constant 0 : i32
    return %arg0, %arg1 : i32, i32
  }
  func.func @transform_1(%arg0: i32, %arg1: i32) -> (i32, i32) {
    %c0_i32 = arith.constant 0 : i32
    %c0_i32_0 = arith.constant 0 : i32
    return %arg0, %c0_i32 : i32, i32
  }
  func.func @transform_2(%arg0: i32, %arg1: i32) -> (i32, i32) {
    %c0_i32 = arith.constant 0 : i32
    %c0_i32_0 = arith.constant 0 : i32
    return %arg0, %c0_i32 : i32, i32
  }
}

</mosaic_0001>

<bundles_post_ra>
// kernel: tpu_custom_call.1
= control target key start
LH: loop header
LB: loop body
LE: loop exit
PB: predicated region body
PF: predicated region fallthrough
CT: control target
= control target key end

     0   :  { %vm12_vm0 = vcmask 261120   ;;  %vm33_vm1 = vcmask 7168   ;;  %s67_s0 = inlined_call_operand.vmem [shape: f32[8,32], index: 0, kind: input, shape index: {}]   ;;  %s68_s1 = inlined_call_operand.vmem [shape: f32[8,1], index: 1, kind: input, shape index: {}]   ;;  %s69_s2 = inlined_call_operand.vmem [shape: f32[8,1], index: 2, kind: output, shape index: {}]  }
   0x1   :  { %v11_v0 = vld [vmem:[%s67_s0] sm:$0xff] }
   0x2   :  { %v13_v1 = vsel %vm12_vm0, %v11_v0, -inf  ;;  %v25_v2 = vsel %vm12_vm0, %v11_v0, 0.0  ;;  %v28_v9 = vld [vmem:[%s68_s1] sm:$0xff] }
   0x3   :  { %14 = vmax.xlane.f32.xlu0 %v13_v1  ;;  %26 = vadd.xlane.f32.xlu1 %v25_v2  ;;  %v29_v13 = vmul.f32 0.9, %v28_v9 }
  0x76   :  { %v15_v3 = vpop.xlane.xlu0 %14  ;;  %v27_v11 = vpop.xlane.xlu1 %26 }
  0x77   :  { %v16_v4 = vsub.f32 %v11_v0, %v15_v3  ;;  %v31_v15 = vmul.f32 0.003125, %v27_v11 }
  0x79   :  { %v17_v5 = vmul.f32 1.442695, %v16_v4 }
  0x7b   :  { %39 = vpow2.f32 %v17_v5 }
  0x81   :  { %v40_v6 = vpop.eup %39 }
  0x82   :  { %v19_v7 = vsel %vm12_vm0, %v40_v6, 0.0 }
  0x83   :  { %20 = vadd.xlane.f32.xlu0 %v19_v7 }
  0xf6   :  { %v21_v8 = vpop.xlane.xlu0 %20 }
  0xf7   :  { %41 = vlog2.f32 %v21_v8 }
  0xfd   :  { %v42_v10 = vpop.eup %41 }
  0xfe   :  { %v23_v12 = vmul.f32 0.6931472, %v42_v10 }
 0x100   :  { %v24_v14 = vadd.f32 %v23_v12, %v15_v3 }
 0x102   :  { %v30_v16 = vsub.f32 %v24_v14, %v29_v13 }
 0x104   :  { %v32_v17 = vsub.f32 %v30_v16, %v31_v15 }
 0x106   :  { %34 = vst.msk [vmem:[%s69_s2] sm:$0xff] %vm33_vm1, %v32_v17 }

</bundles_post_ra>
